<compile_context>
chip_gen: v6e
topology: v6e:2x2x1
jax: 0.10.0
libtpu: 0.0.40
codegen_flags: <defaults>
</compile_context>

<pallas_src>
import math

import jax
import jax.numpy as jnp
from jax.experimental import pallas as pl
from jax.experimental.pallas import tpu as pltpu

# ---------------- config (small, consistent with DbrxConfig fields) ---------
B = 2            # batch
S = 8            # seq len (q_len)
D = 128          # d_model
NH = 4           # n_heads
KVH = 2          # attn_config.kv_n_heads
HD = D // NH     # head_dim = 32
NREP = NH // KVH # num_key_value_groups
QKV = D + 2 * KVH * HD  # Wqkv output dim = 256
CLIP_QKV = 8.0   # attn_config.clip_qkv
ROPE_THETA = 10000.0
NEG_INF = -1e9
INV_SQRT_HD = 1.0 / math.sqrt(HD)


def _rotate_half(x):
    half = x.shape[-1] // 2
    return jnp.concatenate([-x[..., half:], x[..., :half]], axis=-1)


def _dbrx_attn_kernel(x_ref, wqkv_ref, wout_ref, cos_ref, sin_ref, o_ref):
    # x: (B,S,D) bf16; wqkv: (D,QKV) bf16; wout: (D,D) bf16; cos/sin: (S,HD) f32
    x = x_ref[...].reshape(B * S, D)                            # (16, 128) bf16

    # ---- fused QKV projection: one lane-dense MXU pass, f32 accumulate ----
    qkv = jnp.dot(x, wqkv_ref[...], preferred_element_type=jnp.float32)  # (16, 256)
    qkv = jnp.clip(qkv, -CLIP_QKV, CLIP_QKV)                    # clip_qkv (f32)

    # ---- split into heads: static lane slices -> new leading axis ----
    # leading index = head * B + batch; rows inside each head block = b*S + s
    q = jnp.stack([qkv[:, h * HD:(h + 1) * HD] for h in range(NH)], axis=0)
    q = q.reshape(NH * B, S, HD)                                # (8, 8, 32)
    k = jnp.stack([qkv[:, D + j * HD:D + (j + 1) * HD] for j in range(KVH)], axis=0)
    k = k.reshape(KVH * B, S, HD)                               # (4, 8, 32)
    v = jnp.stack([qkv[:, D + KVH * HD + j * HD:D + KVH * HD + (j + 1) * HD]
                   for j in range(KVH)], axis=0)
    v = v.reshape(KVH * B, S, HD)                               # (4, 8, 32)

    # ---- RoPE in f32 (cos/sin broadcast over the leading head*batch axis) ----
    cos = cos_ref[...]                                          # (S, HD)
    sin = sin_ref[...]
    q = q * cos + _rotate_half(q) * sin
    k = k * cos + _rotate_half(k) * sin

    # ---- GQA: broadcast KV heads to NH query heads (leading-dim index math) --
    q_bf = q.astype(jnp.bfloat16)

    def expand_kv(t):                                           # (KVH*B,S,HD)->(NH*B,S,HD)
        t = t.astype(jnp.bfloat16).reshape(KVH, 1, B, S, HD)
        t = jnp.broadcast_to(t, (KVH, NREP, B, S, HD))
        return t.reshape(NH * B, S, HD)

    k_full = expand_kv(k)
    v_full = expand_kv(v)

    # ---- scaled causal attention (batched over B*NH), softmax in f32 ----
    scores = jnp.einsum('bqd,bkd->bqk', q_bf, k_full,
                        preferred_element_type=jnp.float32) * INV_SQRT_HD   # (8,S,S)
    row = jax.lax.broadcasted_iota(jnp.int32, (S, S), 0)
    col = jax.lax.broadcasted_iota(jnp.int32, (S, S), 1)
    causal = jnp.where(row >= col, 0.0, NEG_INF).astype(jnp.float32)
    scores = scores + causal                                    # broadcast (S,S)

    scores = scores - jnp.max(scores, axis=-1, keepdims=True)
    p = jnp.exp(scores)
    denom = jnp.sum(p, axis=-1, keepdims=True)
    p = p * pl.reciprocal(denom, approx=True)

    o = jnp.einsum('bqk,bkd->bqd', p.astype(jnp.bfloat16), v_full,
                   preferred_element_type=jnp.float32)          # (NH*B, S, HD)

    # ---- reassemble lane-dense (B*S, D) and single full-K out_proj matmul ----
    o_bf = o.astype(jnp.bfloat16).reshape(NH, B * S, HD)        # leading-dim regroup
    o_flat = jnp.concatenate([o_bf[h] for h in range(NH)], axis=-1)  # (16, 128)
    out = jnp.dot(o_flat, wout_ref[...], preferred_element_type=jnp.float32)
    o_ref[...] = out.reshape(B, S, D).astype(o_ref.dtype)


@jax.jit
def dbrx_attention(x, wqkvT, woutT, cos, sin):
    """x: (B,S,D) f32; wqkvT: (D,QKV) f32 (pre-transposed Wqkv); woutT: (D,D) f32;
    cos/sin: (S,HD) f32. Returns attn_output (B,S,D) f32."""
    # Glue (trace-time casts only): flat bf16 weights/activations, f32 cos/sin.
    x_bf = x.astype(jnp.bfloat16)
    wqkv_bf = wqkvT.astype(jnp.bfloat16)
    wout_bf = woutT.astype(jnp.bfloat16)
    cos32 = cos.astype(jnp.float32)
    sin32 = sin.astype(jnp.float32)

    flops = (2 * B * S * D * QKV            # fused QKV projection
             + 2 * (B * NH) * S * S * HD    # q @ k^T
             + 2 * (B * NH) * S * S * HD    # p @ v
             + 2 * B * S * D * D)           # out_proj
    transcendentals = (B * NH) * S * S + (B * NH) * S          # exp + reciprocal
    bytes_accessed = (x_bf.size * 2 + wqkv_bf.size * 2 + wout_bf.size * 2
                      + cos32.size * 4 + sin32.size * 4 + B * S * D * 4)

    return pl.pallas_call(
        _dbrx_attn_kernel,
        out_shape=jax.ShapeDtypeStruct((B, S, D), jnp.float32),
        grid=(1,),                                              # batch folded: 1 step
        in_specs=[
            pl.BlockSpec((B, S, D), lambda i: (0, 0, 0)),       # x (bf16)
            pl.BlockSpec((D, QKV), lambda i: (0, 0)),           # Wqkv^T flat (bf16)
            pl.BlockSpec((D, D), lambda i: (0, 0)),             # out_proj^T flat (bf16)
            pl.BlockSpec((S, HD), lambda i: (0, 0)),            # cos
            pl.BlockSpec((S, HD), lambda i: (0, 0)),            # sin
        ],
        out_specs=pl.BlockSpec((B, S, D), lambda i: (0, 0, 0)),
        compiler_params=pltpu.CompilerParams(
            dimension_semantics=("arbitrary",)),
        cost_estimate=pl.CostEstimate(
            flops=flops, transcendentals=transcendentals,
            bytes_accessed=bytes_accessed),
    )(x_bf, wqkv_bf, wout_bf, cos32, sin32)


# -------------------------- pure-JAX f32 reference --------------------------
def reference(x, wqkvT, woutT, cos, sin):
    qkv = jnp.clip(x @ wqkvT, -CLIP_QKV, CLIP_QKV)
    q, k, v = jnp.split(qkv, [D, D + KVH * HD], axis=-1)
    q = q.reshape(B, S, NH, HD).transpose(0, 2, 1, 3)
    k = k.reshape(B, S, KVH, HD).transpose(0, 2, 1, 3)
    v = v.reshape(B, S, KVH, HD).transpose(0, 2, 1, 3)
    c = cos[None, None]
    s = sin[None, None]

    def rot(t):
        half = t.shape[-1] // 2
        return jnp.concatenate([-t[..., half:], t[..., :half]], -1)

    q = q * c + rot(q) * s
    k = k * c + rot(k) * s
    k = jnp.repeat(k, NREP, axis=1)
    v = jnp.repeat(v, NREP, axis=1)
    causal = jnp.tril(jnp.ones((S, S), dtype=bool))
    mask = jnp.where(causal, 0.0, NEG_INF).astype(jnp.float32)
    sc = q @ k.transpose(0, 1, 3, 2) / math.sqrt(HD) + mask[None, None]
    p = jax.nn.softmax(sc, axis=-1)
    ao = (p @ v).transpose(0, 2, 1, 3).reshape(B, S, D)
    return ao @ woutT


if __name__ == "__main__":
    key = jax.random.PRNGKey(0)
    kx, kqkv, kout = jax.random.split(key, 3)

    x = jax.random.normal(kx, (B, S, D), dtype=jnp.float32)

    # torch nn.Linear weight is [out, in]; store pre-transposed for x @ W^T.
    wqkvT = (jax.random.normal(kqkv, (QKV, D), dtype=jnp.float32) * 0.02).T
    woutT = (jax.random.normal(kout, (D, D), dtype=jnp.float32) * 0.02).T

    # RoPE cos/sin tables (DbrxRotaryEmbedding), position_ids = arange(S),
    # identical for every batch element -> pass without batch dim.
    inv_freq = 1.0 / (ROPE_THETA ** (jnp.arange(0, HD, 2, dtype=jnp.float32) / HD))
    pos = jnp.arange(S, dtype=jnp.float32)
    freqs = pos[:, None] * inv_freq[None, :]                 # (S, HD/2)
    emb = jnp.concatenate([freqs, freqs], axis=-1)           # (S, HD)
    cos = jnp.cos(emb).astype(jnp.float32)
    sin = jnp.sin(emb).astype(jnp.float32)

    attn_out = dbrx_attention(x, wqkvT, woutT, cos, sin)
    jax.block_until_ready(attn_out)

    ref_out = reference(x, wqkvT, woutT, cos, sin)

    assert attn_out.shape == (B, S, D)
    assert bool(jnp.all(jnp.isfinite(attn_out)))
    assert jnp.allclose(attn_out, ref_out, atol=2e-2, rtol=2e-2)

    # attn_weights output is None (output_attentions=False path).
    attn_weights = None

    print("KERNEL_OK")
</pallas_src>

<mosaic_0001>
module attributes {stable_mosaic.version = 11 : i64} {
  func.func @_dbrx_attn_kernel(%arg0: i32, %arg1: memref<2x8x128xbf16, #tpu.memory_space<vmem>>, %arg2: memref<128x256xbf16, #tpu.memory_space<vmem>>, %arg3: memref<128x128xbf16, #tpu.memory_space<vmem>>, %arg4: memref<8x32xf32, #tpu.memory_space<vmem>>, %arg5: memref<8x32xf32, #tpu.memory_space<vmem>>, %arg6: memref<2x8x128xf32, #tpu.memory_space<vmem>>) attributes {dimension_semantics = [#tpu.dimension_semantics<arbitrary>], iteration_bounds = array<i64: 1>, scalar_prefetch = 0 : i64, scratch_operands = 0 : i64, tpu.core_type = #tpu.core_type<tc>, window_params = [{pipeline_mode = #tpu.pipeline_mode<synchronous>, transform_indices = @transform_0, window_bounds = array<i64: 2, 8, 128>}, {pipeline_mode = #tpu.pipeline_mode<synchronous>, transform_indices = @transform_1, window_bounds = array<i64: 128, 256>}, {pipeline_mode = #tpu.pipeline_mode<synchronous>, transform_indices = @transform_2, window_bounds = array<i64: 128, 128>}, {pipeline_mode = #tpu.pipeline_mode<synchronous>, transform_indices = @transform_3, window_bounds = array<i64: 8, 32>}, {pipeline_mode = #tpu.pipeline_mode<synchronous>, transform_indices = @transform_4, window_bounds = array<i64: 8, 32>}, {pipeline_mode = #tpu.pipeline_mode<synchronous>, transform_indices = @transform_5, window_bounds = array<i64: 2, 8, 128>}]} {
    %c0 = arith.constant 0 : index
    %c0_0 = arith.constant 0 : index
    %c0_1 = arith.constant 0 : index
    %0 = vector.load %arg1[%c0, %c0_0, %c0_1] : memref<2x8x128xbf16, #tpu.memory_space<vmem>>, vector<2x8x128xbf16>
    %1 = vector.shape_cast %0 : vector<2x8x128xbf16> to vector<16x128xbf16>
    %c0_2 = arith.constant 0 : index
    %c0_3 = arith.constant 0 : index
    %2 = vector.load %arg2[%c0_2, %c0_3] : memref<128x256xbf16, #tpu.memory_space<vmem>>, vector<128x256xbf16>
    %cst = arith.constant dense<0.000000e+00> : vector<16x256xf32>
    %3 = tpu.matmul %1, %2, %cst {dimension_numbers = #tpu.dot_dimension_numbers<[1], [0], [0], [1], [0, 0, 1, 1], [], []>} : vector<16x128xbf16>, vector<128x256xbf16>, vector<16x256xf32> -> vector<16x256xf32>
    %cst_4 = arith.constant -8.000000e+00 : f32
    %cst_5 = arith.constant 8.000000e+00 : f32
    %4 = vector.broadcast %cst_4 : f32 to vector<16x256xf32>
    %5 = arith.maximumf %4, %3 : vector<16x256xf32>
    %6 = vector.broadcast %cst_5 : f32 to vector<16x256xf32>
    %7 = arith.minimumf %6, %5 : vector<16x256xf32>
    %8 = vector.extract_strided_slice %7 {offsets = [0, 0], sizes = [16, 32], strides = [1, 1]} : vector<16x256xf32> to vector<16x32xf32>
    %9 = vector.extract_strided_slice %7 {offsets = [0, 32], sizes = [16, 32], strides = [1, 1]} : vector<16x256xf32> to vector<16x32xf32>
    %10 = vector.extract_strided_slice %7 {offsets = [0, 64], sizes = [16, 32], strides = [1, 1]} : vector<16x256xf32> to vector<16x32xf32>
    %11 = vector.extract_strided_slice %7 {offsets = [0, 96], sizes = [16, 32], strides = [1, 1]} : vector<16x256xf32> to vector<16x32xf32>
    %12 = vector.shape_cast %8 : vector<16x32xf32> to vector<1x16x32xf32>
    %13 = vector.shape_cast %9 : vector<16x32xf32> to vector<1x16x32xf32>
    %14 = vector.shape_cast %10 : vector<16x32xf32> to vector<1x16x32xf32>
    %15 = vector.shape_cast %11 : vector<16x32xf32> to vector<1x16x32xf32>
    %16 = tpu.concatenate %12, %13, %14, %15 in 0 : vector<1x16x32xf32>, vector<1x16x32xf32>, vector<1x16x32xf32>, vector<1x16x32xf32> -> vector<4x16x32xf32>
    %17 = vector.shape_cast %16 : vector<4x16x32xf32> to vector<8x8x32xf32>
    %18 = vector.extract_strided_slice %7 {offsets = [0, 128], sizes = [16, 32], strides = [1, 1]} : vector<16x256xf32> to vector<16x32xf32>
    %19 = vector.extract_strided_slice %7 {offsets = [0, 160], sizes = [16, 32], strides = [1, 1]} : vector<16x256xf32> to vector<16x32xf32>
    %20 = vector.shape_cast %18 : vector<16x32xf32> to vector<1x16x32xf32>
    %21 = vector.shape_cast %19 : vector<16x32xf32> to vector<1x16x32xf32>
    %22 = tpu.concatenate %20, %21 in 0 : vector<1x16x32xf32>, vector<1x16x32xf32> -> vector<2x16x32xf32>
    %23 = vector.shape_cast %22 : vector<2x16x32xf32> to vector<4x8x32xf32>
    %24 = vector.extract_strided_slice %7 {offsets = [0, 192], sizes = [16, 32], strides = [1, 1]} : vector<16x256xf32> to vector<16x32xf32>
    %25 = vector.extract_strided_slice %7 {offsets = [0, 224], sizes = [16, 32], strides = [1, 1]} : vector<16x256xf32> to vector<16x32xf32>
    %26 = vector.shape_cast %24 : vector<16x32xf32> to vector<1x16x32xf32>
    %27 = vector.shape_cast %25 : vector<16x32xf32> to vector<1x16x32xf32>
    %28 = tpu.concatenate %26, %27 in 0 : vector<1x16x32xf32>, vector<1x16x32xf32> -> vector<2x16x32xf32>
    %29 = vector.shape_cast %28 : vector<2x16x32xf32> to vector<4x8x32xf32>
    %c0_6 = arith.constant 0 : index
    %c0_7 = arith.constant 0 : index
    %30 = vector.load %arg4[%c0_6, %c0_7] : memref<8x32xf32, #tpu.memory_space<vmem>>, vector<8x32xf32>
    %c0_8 = arith.constant 0 : index
    %c0_9 = arith.constant 0 : index
    %31 = vector.load %arg5[%c0_8, %c0_9] : memref<8x32xf32, #tpu.memory_space<vmem>>, vector<8x32xf32>
    %32 = vector.shape_cast %30 : vector<8x32xf32> to vector<1x8x32xf32>
    %33 = vector.broadcast %32 : vector<1x8x32xf32> to vector<8x8x32xf32>
    %34 = arith.mulf %17, %33 : vector<8x8x32xf32>
    %35 = vector.extract_strided_slice %17 {offsets = [0, 0, 16], sizes = [8, 8, 16], strides = [1, 1, 1]} : vector<8x8x32xf32> to vector<8x8x16xf32>
    %cst_10 = arith.constant 0.000000e+00 : f32
    %36 = vector.broadcast %cst_10 : f32 to vector<8x8x16xf32>
    %37 = arith.subf %36, %35 : vector<8x8x16xf32>
    %38 = vector.extract_strided_slice %17 {offsets = [0, 0, 0], sizes = [8, 8, 16], strides = [1, 1, 1]} : vector<8x8x32xf32> to vector<8x8x16xf32>
    %39 = tpu.concatenate %37, %38 in 2 : vector<8x8x16xf32>, vector<8x8x16xf32> -> vector<8x8x32xf32>
    %40 = vector.shape_cast %31 : vector<8x32xf32> to vector<1x8x32xf32>
    %41 = vector.broadcast %40 : vector<1x8x32xf32> to vector<8x8x32xf32>
    %42 = arith.mulf %39, %41 : vector<8x8x32xf32>
    %43 = arith.addf %34, %42 : vector<8x8x32xf32>
    %44 = vector.shape_cast %30 : vector<8x32xf32> to vector<1x8x32xf32>
    %45 = vector.broadcast %44 : vector<1x8x32xf32> to vector<4x8x32xf32>
    %46 = arith.mulf %23, %45 : vector<4x8x32xf32>
    %47 = vector.extract_strided_slice %23 {offsets = [0, 0, 16], sizes = [4, 8, 16], strides = [1, 1, 1]} : vector<4x8x32xf32> to vector<4x8x16xf32>
    %cst_11 = arith.constant 0.000000e+00 : f32
    %48 = vector.broadcast %cst_11 : f32 to vector<4x8x16xf32>
    %49 = arith.subf %48, %47 : vector<4x8x16xf32>
    %50 = vector.extract_strided_slice %23 {offsets = [0, 0, 0], sizes = [4, 8, 16], strides = [1, 1, 1]} : vector<4x8x32xf32> to vector<4x8x16xf32>
    %51 = tpu.concatenate %49, %50 in 2 : vector<4x8x16xf32>, vector<4x8x16xf32> -> vector<4x8x32xf32>
    %52 = vector.shape_cast %31 : vector<8x32xf32> to vector<1x8x32xf32>
    %53 = vector.broadcast %52 : vector<1x8x32xf32> to vector<4x8x32xf32>
    %54 = arith.mulf %51, %53 : vector<4x8x32xf32>
    %55 = arith.addf %46, %54 : vector<4x8x32xf32>
    %56 = arith.truncf %43 : vector<8x8x32xf32> to vector<8x8x32xbf16>
    %57 = arith.truncf %55 : vector<4x8x32xf32> to vector<4x8x32xbf16>
    %58 = vector.shape_cast %57 : vector<4x8x32xbf16> to vector<2x1x2x8x32xbf16>
    %59 = vector.shape_cast %58 : vector<2x1x2x8x32xbf16> to vector<2x1x2x8x32xbf16>
    %60 = vector.broadcast %59 : vector<2x1x2x8x32xbf16> to vector<2x2x2x8x32xbf16>
    %61 = vector.shape_cast %60 : vector<2x2x2x8x32xbf16> to vector<8x8x32xbf16>
    %62 = arith.truncf %29 : vector<4x8x32xf32> to vector<4x8x32xbf16>
    %63 = vector.shape_cast %62 : vector<4x8x32xbf16> to vector<2x1x2x8x32xbf16>
    %64 = vector.shape_cast %63 : vector<2x1x2x8x32xbf16> to vector<2x1x2x8x32xbf16>
    %65 = vector.broadcast %64 : vector<2x1x2x8x32xbf16> to vector<2x2x2x8x32xbf16>
    %66 = vector.shape_cast %65 : vector<2x2x2x8x32xbf16> to vector<8x8x32xbf16>
    "tpu.trace_start"() <{level = 10 : i32, message = "bqd,bkd->bqk"}> : () -> ()
    %cst_12 = arith.constant dense<0.000000e+00> : vector<8x8x8xf32>
    %67 = tpu.matmul %56, %61, %cst_12 {dimension_numbers = #tpu.dot_dimension_numbers<[2], [2], [1], [1], [0, 0, 0, 1, 1, 1], [0], [0]>} : vector<8x8x32xbf16>, vector<8x8x32xbf16>, vector<8x8x8xf32> -> vector<8x8x8xf32>
    "tpu.trace_stop"() : () -> ()
    %cst_13 = arith.constant 0.176776692 : f32
    %68 = vector.broadcast %cst_13 : f32 to vector<8x8x8xf32>
    %69 = arith.mulf %67, %68 : vector<8x8x8xf32>
    %70 = tpu.iota {dimensions = array<i32: 0>} : vector<8x8xi32>
    %71 = tpu.iota {dimensions = array<i32: 1>} : vector<8x8xi32>
    %72 = arith.cmpi sge, %70, %71 : vector<8x8xi32>
    %cst_14 = arith.constant 0.000000e+00 : f32
    %cst_15 = arith.constant -1.000000e+09 : f32
    %73 = vector.broadcast %cst_14 : f32 to vector<8x8xf32>
    %74 = vector.broadcast %cst_15 : f32 to vector<8x8xf32>
    %75 = arith.select %72, %73, %74 : vector<8x8xi1>, vector<8x8xf32>
    %76 = vector.shape_cast %75 : vector<8x8xf32> to vector<1x8x8xf32>
    %77 = vector.broadcast %76 : vector<1x8x8xf32> to vector<8x8x8xf32>
    %78 = arith.addf %69, %77 : vector<8x8x8xf32>
    %cst_16 = arith.constant dense<0xFF800000> : vector<8x8xf32>
    %79 = vector.multi_reduction <maximumf>, %78, %cst_16 [2] : vector<8x8x8xf32> to vector<8x8xf32>
    %80 = vector.shape_cast %79 : vector<8x8xf32> to vector<8x8x1xf32>
    %81 = vector.broadcast %80 : vector<8x8x1xf32> to vector<8x8x8xf32>
    %82 = arith.subf %78, %81 : vector<8x8x8xf32>
    %83 = math.exp %82 : vector<8x8x8xf32>
    %cst_17 = arith.constant dense<0.000000e+00> : vector<8x8xf32>
    %84 = vector.multi_reduction <add>, %83, %cst_17 [2] : vector<8x8x8xf32> to vector<8x8xf32>
    %85 = vector.shape_cast %84 : vector<8x8xf32> to vector<8x8x1xf32>
    %86 = tpu.reciprocal %85 {approx = true} : vector<8x8x1xf32> -> vector<8x8x1xf32>
    %87 = vector.broadcast %86 : vector<8x8x1xf32> to vector<8x8x8xf32>
    %88 = arith.mulf %83, %87 : vector<8x8x8xf32>
    %89 = arith.truncf %88 : vector<8x8x8xf32> to vector<8x8x8xbf16>
    "tpu.trace_start"() <{level = 10 : i32, message = "bqk,bkd->bqd"}> : () -> ()
    %cst_18 = arith.constant dense<0.000000e+00> : vector<8x8x32xf32>
    %90 = tpu.matmul %89, %66, %cst_18 {dimension_numbers = #tpu.dot_dimension_numbers<[2], [1], [1], [2], [0, 0, 0, 1, 1, 2], [0], [0]>} : vector<8x8x8xbf16>, vector<8x8x32xbf16>, vector<8x8x32xf32> -> vector<8x8x32xf32>
    "tpu.trace_stop"() : () -> ()
    %91 = arith.truncf %90 : vector<8x8x32xf32> to vector<8x8x32xbf16>
    %92 = vector.shape_cast %91 : vector<8x8x32xbf16> to vector<4x16x32xbf16>
    %93 = vector.extract_strided_slice %92 {offsets = [0, 0, 0], sizes = [1, 16, 32], strides = [1, 1, 1]} : vector<4x16x32xbf16> to vector<1x16x32xbf16>
    %94 = vector.shape_cast %93 : vector<1x16x32xbf16> to vector<16x32xbf16>
    %95 = vector.extract_strided_slice %92 {offsets = [1, 0, 0], sizes = [1, 16, 32], strides = [1, 1, 1]} : vector<4x16x32xbf16> to vector<1x16x32xbf16>
    %96 = vector.shape_cast %95 : vector<1x16x32xbf16> to vector<16x32xbf16>
    %97 = vector.extract_strided_slice %92 {offsets = [2, 0, 0], sizes = [1, 16, 32], strides = [1, 1, 1]} : vector<4x16x32xbf16> to vector<1x16x32xbf16>
    %98 = vector.shape_cast %97 : vector<1x16x32xbf16> to vector<16x32xbf16>
    %99 = vector.extract_strided_slice %92 {offsets = [3, 0, 0], sizes = [1, 16, 32], strides = [1, 1, 1]} : vector<4x16x32xbf16> to vector<1x16x32xbf16>
    %100 = vector.shape_cast %99 : vector<1x16x32xbf16> to vector<16x32xbf16>
    %101 = tpu.concatenate %94, %96, %98, %100 in 1 : vector<16x32xbf16>, vector<16x32xbf16>, vector<16x32xbf16>, vector<16x32xbf16> -> vector<16x128xbf16>
    %c0_19 = arith.constant 0 : index
    %c0_20 = arith.constant 0 : index
    %102 = vector.load %arg3[%c0_19, %c0_20] : memref<128x128xbf16, #tpu.memory_space<vmem>>, vector<128x128xbf16>
    %cst_21 = arith.constant dense<0.000000e+00> : vector<16x128xf32>
    %103 = tpu.matmul %101, %102, %cst_21 {dimension_numbers = #tpu.dot_dimension_numbers<[1], [0], [0], [1], [0, 0, 1, 1], [], []>} : vector<16x128xbf16>, vector<128x128xbf16>, vector<16x128xf32> -> vector<16x128xf32>
    %104 = vector.shape_cast %103 : vector<16x128xf32> to vector<2x8x128xf32>
    %c0_22 = arith.constant 0 : index
    %c0_23 = arith.constant 0 : index
    %c0_24 = arith.constant 0 : index
    %105 = vector.load %arg6[%c0_22, %c0_23, %c0_24] : memref<2x8x128xf32, #tpu.memory_space<vmem>>, vector<2x8x128xf32>
    tpu.vector_store %arg6[%c0_22, %c0_23, %c0_24], %104 {strides = array<i32>} : memref<2x8x128xf32, #tpu.memory_space<vmem>>, vector<2x8x128xf32>,
    return
  }
  func.func @transform_0(%arg0: i32) -> (i32, i32, i32) {
    %c0_i32 = arith.constant 0 : i32
    %c0_i32_0 = arith.constant 0 : i32
    %c0_i32_1 = arith.constant 0 : i32
    %c0_i32_2 = arith.constant 0 : i32
    return %c0_i32, %c0_i32_0, %c0_i32_1 : i32, i32, i32
  }
  func.func @transform_1(%arg0: i32) -> (i32, i32) {
    %c0_i32 = arith.constant 0 : i32
    %c0_i32_0 = arith.constant 0 : i32
    %c0_i32_1 = arith.constant 0 : i32
    return %c0_i32, %c0_i32_0 : i32, i32
  }
  func.func @transform_2(%arg0: i32) -> (i32, i32) {
    %c0_i32 = arith.constant 0 : i32
    %c0_i32_0 = arith.constant 0 : i32
    %c0_i32_1 = arith.constant 0 : i32
    return %c0_i32, %c0_i32_0 : i32, i32
  }
  func.func @transform_3(%arg0: i32) -> (i32, i32) {
    %c0_i32 = arith.constant 0 : i32
    %c0_i32_0 = arith.constant 0 : i32
    %c0_i32_1 = arith.constant 0 : i32
    return %c0_i32, %c0_i32_0 : i32, i32
  }
  func.func @transform_4(%arg0: i32) -> (i32, i32) {
    %c0_i32 = arith.constant 0 : i32
    %c0_i32_0 = arith.constant 0 : i32
    %c0_i32_1 = arith.constant 0 : i32
    return %c0_i32, %c0_i32_0 : i32, i32
  }
  func.func @transform_5(%arg0: i32) -> (i32, i32, i32) {
    %c0_i32 = arith.constant 0 : i32
    %c0_i32_0 = arith.constant 0 : i32
    %c0_i32_1 = arith.constant 0 : i32
    %c0_i32_2 = arith.constant 0 : i32
    return %c0_i32, %c0_i32_0, %c0_i32_1 : i32, i32, i32
  }
}

</mosaic_0001>

<bundles_post_ra>
// kernel: dbrx_attention.1
= control target key start
LH: loop header
LB: loop body
LE: loop exit
PB: predicated region body
PF: predicated region fallthrough
CT: control target
= control target key end

     0   :  { %v1689_v2 = vmov 0   ;;  %s2096_s0 = inlined_call_operand.vmem [shape: bf16[2,8,128], index: 0, kind: input, shape index: {}]   ;;  %s2097_s1 = inlined_call_operand.vmem [shape: bf16[128,256], index: 1, kind: input, shape index: {}]   ;;  %s2098_s2 = inlined_call_operand.vmem [shape: bf16[128,128], index: 2, kind: input, shape index: {}]   ;;  %s2099_s3 = inlined_call_operand.vmem [shape: f32[8,32], index: 3, kind: input, shape index: {}]   ;;  %s2100_s4 = inlined_call_operand.vmem [shape: f32[8,32], index: 4, kind: input, shape index: {}]   ;;  %s2101_s5 = inlined_call_operand.hbm [shape: f32[2,8,128], index: 5, kind: output, shape index: {}]  }
   0x1   :  { %v1602_v0 = vld [vmem:[%s2097_s1 + $0x74] ss:$8 sps:$4 sm:$0xff]   ;;  %v1604_v1 = vld [vmem:[%s2097_s1 + $0x70] ss:$8 sps:$4 sm:$0xff]   ;;  %158 = vmatprep.mubr.bf16.mxu0 %v1689_v2  ;;  %v1605_v3 = vld [vmem:[%s2097_s1 + $0x64] ss:$8 sps:$4 sm:$0xff]  }
   0x2   :  { %126 = vmatprep.subr.bf16.mxu0 %v1602_v0  ;;  %v1607_v4 = vld [vmem:[%s2097_s1 + $0x60] ss:$8 sps:$4 sm:$0xff]   ;;  %v1608_v5 = vld [vmem:[%s2097_s1 + $0x54] ss:$8 sps:$4 sm:$0xff]   ;;  %v1610_v6 = vld [vmem:[%s2097_s1 + $0x50] ss:$8 sps:$4 sm:$0xff]  }
   0x3   :  { %127 = vmatpush1.bf16.msra.mxu0 %v1604_v1  ;;  %v1611_v7 = vld [vmem:[%s2097_s1 + $0x44] ss:$8 sps:$4 sm:$0xff]   ;;  %v1613_v8 = vld [vmem:[%s2097_s1 + $0x40] ss:$8 sps:$4 sm:$0xff]   ;;  %v1614_v9 = vld [vmem:[%s2097_s1 + $0x34] ss:$8 sps:$4 sm:$0xff]  }
   0x4   :  { %128 = vmatprep.subr.bf16.mxu0 %v1605_v3  ;;  %v1616_v10 = vld [vmem:[%s2097_s1 + $0x30] ss:$8 sps:$4 sm:$0xff]   ;;  %v1617_v11 = vld [vmem:[%s2097_s1 + $0x24] ss:$8 sps:$4 sm:$0xff]  }
   0x7   :  { %129 = vmatpush1.bf16.msra.mxu0 %v1607_v4 }
   0x8   :  { %130 = vmatprep.subr.bf16.mxu0 %v1608_v5 }
   0xb   :  { %131 = vmatpush1.bf16.msra.mxu0 %v1610_v6 }
   0xc   :  { %132 = vmatprep.subr.bf16.mxu0 %v1611_v7 }
   0xf   :  { %133 = vmatpush1.bf16.msra.mxu0 %v1613_v8 }
  0x10   :  { %134 = vmatprep.subr.bf16.mxu0 %v1614_v9 }
  0x11   :  { %10 = vsyncpa [#allocation3], 0  ;;  %v1619_v12 = vld [vmem:[%s2097_s1 + $0x20] ss:$8 sps:$4 sm:$0xff]   ;;  %v1620_v13 = vld [vmem:[%s2097_s1 + $0x14] ss:$8 sps:$4 sm:$0xff]  }
  0x12   :  { %v1622_v14 = vld [vmem:[%s2097_s1 + $0x10] ss:$8 sps:$4 sm:$0xff]   ;;  %v1623_v15 = vld [vmem:[%s2097_s1 + $0x4] ss:$8 sps:$4 sm:$0xff]   ;;  %v1625_v16 = vld [vmem:[%s2097_s1] ss:$8 sps:$4 sm:$0xff]  }
  0x13   :  { %135 = vmatpush1.bf16.msra.mxu0 %v1616_v10  ;;  %v1626_v17 = vld [vmem:[%s2096_s0] sm:$0xff]   ;;  %s1690_s27 = smov 96   ;;  %s1691_s0 = smov 64   ;;  %v1692_v26 = vmov 0.0   ;;  %vm1696_vm0 = vmmov 0   ;;  %vm279_vm1 = vcmask 130048  }
  0x14   :  { %136 = vmatprep.subr.bf16.mxu0 %v1617_v11  ;;  %1474 = vmatprep.subr.bf16.mxu1 %v1692_v26  ;;  %s1693_s1 = smov 32   ;;  %s1694_s28 = smov 112   ;;  %v1861_v43 = vld [vmem:[%s2100_s4] sm:$0xff]  ;;  %vm368_vm2 = vcmask 261120   ;;  %vm747_vm4 = vcmask 64512   ;;  %vm850_vm5 = vcmask 1043456  }
  0x15   :  { %s1695_s29 = smov 16   ;;  %1476 = vmatprep.mubr.msk.bf16.mxu1 %vm1696_vm0, %v1692_v26  ;;  %v1866_v45 = vld [vmem:[%s2099_s3] sm:$0xff]  ;;  %vm1250_vm6 = vcmask 523264   ;;  %vm1253_vm7 = vcmask 785408  }
  0x17   :  { %137 = vmatpush1.bf16.msra.mxu0 %v1619_v12 }
  0x18   :  { %138 = vmatprep.subr.bf16.mxu0 %v1620_v13 }
  0x1b   :  { %139 = vmatpush1.bf16.msra.mxu0 %v1622_v14 }
  0x1c   :  { %140 = vmatprep.subr.bf16.mxu0 %v1623_v15 }
  0x1f   :  { %141 = vmatpush1.bf16.msra.mxu0 %v1625_v16 }
  0x20   :  { %1522 = vmatprep.subr.bf16.mxu0 %v1692_v26 }
  0x22   :  { %159 = vmatmul.mubr.bf16.vlgmr.msra.gmra.mxu0 %v1626_v17 }
  0x23   :  { %1524 = vmatprep.mubr.msk.bf16.mxu0 %vm1696_vm0, %v1692_v26 }
  0xe2   :  { %v160_v18 = vpop.f32.mrf.mxu0 }
  0xe3   :  { %v1782_v19 = vclamps-f32 %v160_v18, 8.0 }
  0xe4   :  { %v162_v20 = vpop.f32.mrf.mxu0 }
  0xe5   :  { %v1784_v21 = vclamps-f32 %v162_v20, 8.0  ;;  %179 = vrot.lane.b32.xlu0 %v1782_v19, %s1690_s27  ;;  %v215_v28 = vsub.f32 0.0, %v1782_v19  ;;  %v207_v57 = vmul.f32 %v1782_v19, %v1866_v45 }
  0xe6   :  { %v164_v22 = vpop.f32.mrf.mxu0 }
  0xe7   :  { %v1788_v23 = vclamps-f32 %v164_v22, 8.0  ;;  %199 = vrot.lane.b32.xlu1 %v1784_v21, %s1690_s27  ;;  %v308_v27 = vsub.f32 0.0, %v1784_v21  ;;  %v304_v50 = vmul.f32 %v1784_v21, %v1866_v45 }
  0xe8   :  { %v166_v24 = vpop.f32.mrf.mxu0 }
  0xe9   :  { %181 = vrot.lane.b32.xlu0 %v1788_v23, %s1690_s27  ;;  %v1794_v25 = vclamps-f32 %v166_v24, 8.0  ;;  %v216_v30 = vsub.f32 0.0, %v1788_v23  ;;  %v208_v11 = vmul.f32 %v1788_v23, %v1866_v45 }
  0xeb   :  { %185 = vrot.lane.b32.xlu1 %v1782_v19, %s1691_s0  ;;  %v309_v29 = vsub.f32 0.0, %v1794_v25  ;;  %v305_v1 = vmul.f32 %v1794_v25, %v1866_v45 }
  0xed   :  { %201 = vrot.lane.b32.xlu0 %v1794_v25, %s1690_s27 }
  0xef   :  { %187 = vrot.lane.b32.xlu1 %v1788_v23, %s1691_s0 }
  0xf1   :  { %191 = vrot.lane.b32.xlu0 %v1782_v19, %s1693_s1 }
  0xf3   :  { %316 = vrot.lane.b32.xlu1 %v308_v27, %s1694_s28 }
  0xf5   :  { %328 = vrot.lane.b32.xlu0 %v1784_v21, %s1695_s29 }
  0xf7   :  { %193 = vrot.lane.b32.xlu1 %v1788_v23, %s1693_s1 }
  0xf9   :  { %231 = vrot.lane.b32.xlu0 %v215_v28, %s1694_s28 }
  0xfb   :  { %255 = vrot.lane.b32.xlu1 %v1782_v19, %s1695_s29 }
  0xfd   :  { %318 = vrot.lane.b32.xlu0 %v309_v29, %s1694_s28 }
  0xff   :  { %330 = vrot.lane.b32.xlu1 %v1794_v25, %s1695_s29 }
 0x101   :  { %233 = vrot.lane.b32.xlu0 %v216_v30, %s1694_s28 }
 0x103   :  { %257 = vrot.lane.b32.xlu1 %v1788_v23, %s1695_s29 }
 0x157   :  { %v1828_v31 = vpop.permute.xlu0 %179 }
 0x158   :  { %v217_v32 = vsub.f32 0.0, %v1828_v31  ;;  %259 = vrot.lane.b32.xlu1 %v1828_v31, %s1695_s29  ;;  %v209_v18 = vmul.f32 %v1866_v45, %v1828_v31 }
 0x159   :  { %v1833_v33 = vpop.permute.xlu1 %199 }
 0x15a   :  { %235 = vrot.lane.b32.xlu0 %v217_v32, %s1694_s28  ;;  %v310_v35 = vsub.f32 0.0, %v1833_v33  ;;  %v306_v27 = vmul.f32 %v1866_v45, %v1833_v33 }
 0x15b   :  { %v1836_v34 = vpop.permute.xlu0 %181 }
 0x15c   :  { %332 = vrot.lane.b32.xlu1 %v1833_v33, %s1695_s29  ;;  %v218_v38 = vsub.f32 0.0, %v1836_v34 }
 0x15d   :  { %v1841_v36 = vpop.permute.xlu1 %185 }
 0x15e   :  { %320 = vrot.lane.b32.xlu0 %v310_v35, %s1694_s28  ;;  %v219_v41 = vsub.f32 0.0, %v1841_v36 }
 0x15f   :  { %v1844_v37 = vpop.permute.xlu0 %201 }
 0x160   :  { %261 = vrot.lane.b32.xlu1 %v1836_v34, %s1695_s29  ;;  %v311_v47 = vsub.f32 0.0, %v1844_v37 }
 0x161   :  { %v1849_v39 = vpop.permute.xlu1 %187 }
 0x162   :  { %237 = vrot.lane.b32.xlu0 %v218_v38, %s1694_s28  ;;  %v220_v53 = vsub.f32 0.0, %v1849_v39  ;;  %v210_v38 = vmul.f32 %v1866_v45, %v1836_v34 }
 0x163   :  { %v1852_v40 = vpop.permute.xlu0 %191 }
 0x164   :  { %263 = vrot.lane.b32.xlu1 %v1841_v36, %s1695_s29  ;;  %v221_v61 = vsub.f32 0.0, %v1852_v40 }
 0x165   :  { %v317_v42 = vpop.permute.xlu1 %316 }
 0x166   :  { %239 = vrot.lane.b32.xlu0 %v219_v41, %s1694_s28 }
 0x167   :  { %v329_v44 = vpop.permute.xlu0 %328 }
 0x168   :  { %v340_v46 = vsel %vm279_vm1, %v317_v42, %v329_v44  ;;  %334 = vrot.lane.b32.xlu1 %v1844_v37, %s1695_s29 }
 0x169   :  { %v344_v48 = vmul.f32 %v340_v46, %v1861_v43  ;;  %v1873_v49 = vpop.permute.xlu1 %193 }
 0x16a   :  { %322 = vrot.lane.b32.xlu0 %v311_v47, %s1694_s28  ;;  %v222_v3 = vsub.f32 0.0, %v1873_v49 }
 0x16b   :  { %v232_v51 = vpop.permute.xlu0 %231  ;;  %v348_v52 = vadd.f32 %v344_v48, %v304_v50 }
 0x16c   :  { %265 = vrot.lane.b32.xlu1 %v1849_v39, %s1695_s29 }
 0x16d   :  { %v256_v54 = vpop.permute.xlu1 %255  ;;  %v360_v55 = vpack.c.bf16 %v348_v52, %v348_v52 }
 0x16e   :  { %v280_v56 = vsel %vm279_vm1, %v232_v51, %v256_v54  ;;  %241 = vrot.lane.b32.xlu0 %v220_v53, %s1694_s28  ;;  %v211_v53 = vmul.f32 %v1866_v45, %v1841_v36 }
 0x16f   :  { %v288_v58 = vmul.f32 %v280_v56, %v1861_v43  ;;  %v319_v59 = vpop.permute.xlu0 %318  ;;  %v373_v60 = vsel %vm368_vm2, %v360_v55, 0  ;;  %v307_v56 = vmul.f32 %v1866_v45, %v1844_v37 }
 0x170   :  { %267 = vrot.lane.b32.xlu1 %v1852_v40, %s1695_s29  ;;  %1475 = vmatpush3.bf16.xpose.msra.mxu1 %v373_v60 }
 0x171   :  { %v296_v62 = vadd.f32 %v288_v58, %v207_v57  ;;  %v331_v63 = vpop.permute.xlu1 %330  ;;  %1480 = vmatprep.subr.bf16.mxu1 %v1692_v26 }
 0x172   :  { %v341_v0 = vsel %vm279_vm1, %v319_v59, %v331_v63  ;;  %243 = vrot.lane.b32.xlu0 %v221_v61, %s1694_s28 }
 0x173   :  { %v345_v2 = vmul.f32 %v341_v0, %v1861_v43  ;;  %v352_v4 = vpack.c.bf16 %v296_v62, %v296_v62  ;;  %v234_v6 = vpop.permute.xlu0 %233 }
 0x174   :  { %269 = vrot.lane.b32.xlu1 %v1873_v49, %s1695_s29 }
 0x175   :  { %v349_v5 = vadd.f32 %v345_v2, %v305_v1  ;;  %v258_v7 = vpop.permute.xlu1 %257  ;;  %v212_v1 = vmul.f32 %v1866_v45, %v1849_v39  ;;  %v213_v39 = vmul.f32 %v1866_v45, %v1852_v40 }
 0x176   :  { %v281_v8 = vsel %vm279_vm1, %v234_v6, %v258_v7  ;;  %245 = vrot.lane.b32.xlu0 %v222_v3, %s1694_s28 }
 0x177   :  { %v361_v9 = vpack.c.bf16 %v349_v5, %v349_v5  ;;  %v289_v10 = vmul.f32 %v281_v8, %v1861_v43  ;;  %1477 = vmatmul.mubr.msk.bf16.vlgmr.msra.gmra.mxu1 %vm368_vm2, %v352_v4 }
 0x178   :  { %1482 = vmatprep.mubr.msk.bf16.mxu1 %vm1696_vm0, %v1692_v26 }
 0x179   :  { %v419_v12 = vsel %vm368_vm2, %v361_v9, 0  ;;  %v297_v13 = vadd.f32 %v289_v10, %v208_v11 }
 0x17a   :  { %1481 = vmatpush3.bf16.xpose.msra.mxu1 %v419_v12 }
 0x17b   :  { %1486 = vmatprep.subr.bf16.mxu1 %v1692_v26  ;;  %v353_v14 = vpack.c.bf16 %v297_v13, %v297_v13 }
 0x181   :  { %1483 = vmatmul.mubr.msk.bf16.vlgmr.msra.gmra.mxu1 %vm368_vm2, %v353_v14 }
 0x182   :  { %1487 = vmatpush3.bf16.xpose.msra.mxu1 %v373_v60  ;;  %1488 = vmatprep.mubr.msk.bf16.mxu1 %vm1696_vm0, %v1692_v26 }
 0x183   :  { %1492 = vmatprep.subr.bf16.mxu1 %v1692_v26 }
 0x1ca   :  { %v260_v15 = vpop.permute.xlu1 %259 }
 0x1cc   :  { %v236_v16 = vpop.permute.xlu0 %235 }
 0x1cd   :  { %v282_v17 = vsel %vm279_vm1, %v236_v16, %v260_v15  ;;  %v214_v15 = vmul.f32 %v1866_v45, %v1873_v49  ;;  %v1697_v49 = vmov -1e+09  }
 0x1ce   :  { %v290_v19 = vmul.f32 %v282_v17, %v1861_v43  ;;  %v333_v20 = vpop.permute.xlu1 %332  ;;  %v733_v17 = vlaneseq }
 0x1d0   :  { %v298_v22 = vadd.f32 %v290_v19, %v209_v18  ;;  %v321_v23 = vpop.permute.xlu0 %320  ;;  %v736_v18 = vand.u32 127, %v733_v17 }
 0x1d1   :  { %v342_v24 = vsel %vm279_vm1, %v321_v23, %v333_v20 }
 0x1d2   :  { %v354_v28 = vpack.c.bf16 %v298_v22, %v298_v22  ;;  %v346_v29 = vmul.f32 %v342_v24, %v1861_v43  ;;  %v262_v30 = vpop.permute.xlu1 %261 }
 0x1d4   :  { %v350_v32 = vadd.f32 %v346_v29, %v306_v27  ;;  %v238_v35 = vpop.permute.xlu0 %237  ;;  %1489 = vmatmul.mubr.msk.bf16.vlgmr.msra.gmra.mxu1 %vm368_vm2, %v354_v28 }
 0x1d5   :  { %v283_v31 = vsel %vm279_vm1, %v238_v35, %v262_v30  ;;  %1493 = vmatpush3.bf16.xpose.msra.mxu1 %v419_v12  ;;  %1494 = vmatprep.mubr.msk.bf16.mxu1 %vm1696_vm0, %v1692_v26 }
 0x1d6   :  { %v291_v41 = vmul.f32 %v283_v31, %v1861_v43  ;;  %v264_v42 = vpop.permute.xlu1 %263  ;;  %1498 = vmatprep.subr.bf16.mxu1 %v1692_v26  ;;  %v362_v44 = vpack.c.bf16 %v350_v32, %v350_v32 }
 0x1d8   :  { %v299_v46 = vadd.f32 %v291_v41, %v210_v38  ;;  %v240_v47 = vpop.permute.xlu0 %239  ;;  %v551_v34 = vsel %vm368_vm2, %v362_v44, 0 }
 0x1d9   :  { %v284_v48 = vsel %vm279_vm1, %v240_v47, %v264_v42 }
 0x1da   :  { %v355_v50 = vpack.c.bf16 %v299_v46, %v299_v46  ;;  %v292_v51 = vmul.f32 %v284_v48, %v1861_v43  ;;  %v335_v52 = vpop.permute.xlu1 %334 }
 0x1dc   :  { %v323_v54 = vpop.permute.xlu0 %322  ;;  %1495 = vmatmul.mubr.msk.bf16.vlgmr.msra.gmra.mxu1 %vm368_vm2, %v355_v50  ;;  %v300_v57 = vadd.f32 %v292_v51, %v211_v53 }
 0x1dd   :  { %v343_v55 = vsel %vm279_vm1, %v323_v54, %v335_v52  ;;  %1499 = vmatpush3.bf16.xpose.msra.mxu1 %v551_v34  ;;  %1500 = vmatprep.mubr.msk.bf16.mxu1 %vm1696_vm0, %v1692_v26 }
 0x1de   :  { %v347_v58 = vmul.f32 %v343_v55, %v1861_v43  ;;  %1504 = vmatprep.subr.bf16.mxu1 %v1692_v26  ;;  %v266_v59 = vpop.permute.xlu1 %265  ;;  %v356_v62 = vpack.c.bf16 %v300_v57, %v300_v57 }
 0x1e0   :  { %v351_v36 = vadd.f32 %v347_v58, %v307_v56  ;;  %v242_v60 = vpop.permute.xlu0 %241 }
 0x1e1   :  { %v285_v61 = vsel %vm279_vm1, %v242_v60, %v266_v59 }
 0x1e2   :  { %v363_v63 = vpack.c.bf16 %v351_v36, %v351_v36  ;;  %v293_v0 = vmul.f32 %v285_v61, %v1861_v43  ;;  %v268_v5 = vpop.permute.xlu1 %267 }
 0x1e4   :  { %v244_v2 = vpop.permute.xlu0 %243  ;;  %1501 = vmatmul.mubr.msk.bf16.vlgmr.msra.gmra.mxu1 %vm368_vm2, %v356_v62  ;;  %v597_v3 = vsel %vm368_vm2, %v363_v63, 0  ;;  %v301_v4 = vadd.f32 %v293_v0, %v212_v1 }
 0x1e5   :  { %1505 = vmatpush3.bf16.xpose.msra.mxu1 %v597_v3  ;;  %1506 = vmatprep.mubr.msk.bf16.mxu1 %vm1696_vm0, %v1692_v26  ;;  %v286_v6 = vsel %vm279_vm1, %v244_v2, %v268_v5 }
 0x1e6   :  { %1510 = vmatprep.subr.bf16.mxu1 %v1692_v26  ;;  %v357_v7 = vpack.c.bf16 %v301_v4, %v301_v4  ;;  %v294_v8 = vmul.f32 %v286_v6, %v1861_v43  ;;  %v270_v11 = vpop.permute.xlu1 %269 }
 0x1e8   :  { %v246_v9 = vpop.permute.xlu0 %245  ;;  %v302_v10 = vadd.f32 %v294_v8, %v213_v39 }
 0x1e9   :  { %v287_v12 = vsel %vm279_vm1, %v246_v9, %v270_v11 }
 0x1ea   :  { %v358_v13 = vpack.c.bf16 %v302_v10, %v302_v10  ;;  %v295_v14 = vmul.f32 %v287_v12, %v1861_v43  ;;  %v734_v43 = vshrl.u32 %v733_v17, 7 }
 0x1ec   :  { %1507 = vmatmul.mubr.msk.bf16.vlgmr.msra.gmra.mxu1 %vm368_vm2, %v357_v7  ;;  %v303_v40 = vadd.f32 %v295_v14, %v214_v15  ;;  %vm737_vm3 = vcmp.ge.s32.totalorder %v734_v43, %v736_v18  ;;  %v364_v18 = vpack.c.bf16 %v1784_v21, %v1784_v21 }
 0x1ed   :  { %1511 = vmatpush3.bf16.xpose.msra.mxu1 %v551_v34  ;;  %1512 = vmatprep.mubr.msk.bf16.mxu1 %vm1696_vm0, %v1692_v26  ;;  %v738_v19 = vsel %vm737_vm3, 0.0, %v1697_v49 }
 0x1ee   :  { %1516 = vmatprep.subr.bf16.mxu1 %v1692_v26  ;;  %v359_v16 = vpack.c.bf16 %v303_v40, %v303_v40 }
 0x1f4   :  { %1513 = vmatmul.mubr.msk.bf16.vlgmr.msra.gmra.mxu1 %vm368_vm2, %v358_v13 }
 0x1f5   :  { %1517 = vmatpush3.bf16.xpose.msra.mxu1 %v597_v3  ;;  %1518 = vmatprep.mubr.msk.bf16.mxu1 %vm1696_vm0, %v1692_v26 }
 0x1f6   :  { %1528 = vmatprep.subr.bf16.mxu1 %v1692_v26 }
 0x1fc   :  { %1519 = vmatmul.mubr.msk.bf16.vlgmr.msra.gmra.mxu1 %vm368_vm2, %v359_v16 }
 0x1fd   :  { %1530 = vmatprep.mubr.msk.bf16.mxu1 %vm1696_vm0, %v1692_v26 }
 0x237   :  { %v409_v45 = vpop.f32.mrf.mxu1 }
 0x238   :  { %v725_v20 = vmul.f32 0.17677669, %v409_v45 }
 0x239   :  { %v1478_v22 = vpop.f32.mrf.mxu1 }
 0x23a   :  { %v1970_v23 = vadd.f32 %v738_v19, %v725_v20 }
 0x23b   :  { %v412_v24 = vpop.f32.mrf.mxu1 }
 0x23c   :  { %v748_v27 = vsel %vm747_vm4, %v1970_v23, -inf }
 0x23d   :  { %v1479_v28 = vpop.f32.mrf.mxu1  ;;  %749 = vmax.xlane.f32.xlu0 %v748_v27 }
 0x241   :  { %v455_v29 = vpop.f32.mrf.mxu1 }
 0x242   :  { %v726_v30 = vmul.f32 0.17677669, %v455_v29 }
 0x243   :  { %v1484_v32 = vpop.f32.mrf.mxu1 }
 0x244   :  { %v740_v35 = vadd.f32 %v738_v19, %v726_v30 }
 0x245   :  { %v458_v31 = vpop.f32.mrf.mxu1 }
 0x246   :  { %v751_v38 = vsel %vm747_vm4, %v740_v35, -inf }
 0x247   :  { %752 = vmax.xlane.f32.xlu1 %v751_v38  ;;  %v1485_v41 = vpop.f32.mrf.mxu1 }
 0x294   :  { %v498_v42 = vpop.f32.mrf.mxu1 }
 0x295   :  { %v727_v44 = vmul.f32 0.17677669, %v498_v42 }
 0x296   :  { %v1490_v46 = vpop.f32.mrf.mxu1 }
 0x297   :  { %v1975_v47 = vadd.f32 %v738_v19, %v727_v44 }
 0x298   :  { %v501_v48 = vpop.f32.mrf.mxu1 }
 0x299   :  { %v754_v50 = vsel %vm747_vm4, %v1975_v47, -inf }
 0x29a   :  { %755 = vmax.xlane.f32.xlu0 %v754_v50  ;;  %v1491_v51 = vpop.f32.mrf.mxu1 }
 0x29c   :  { %v541_v52 = vpop.f32.mrf.mxu1 }
 0x29d   :  { %v728_v53 = vmul.f32 0.17677669, %v541_v52 }
 0x29e   :  { %v1496_v54 = vpop.f32.mrf.mxu1 }
 0x29f   :  { %v742_v34 = vadd.f32 %v738_v19, %v728_v53 }
 0x2a0   :  { %v544_v55 = vpop.f32.mrf.mxu1 }
 0x2a1   :  { %v757_v56 = vsel %vm747_vm4, %v742_v34, -inf }
 0x2a2   :  { %758 = vmax.xlane.f32.xlu0 %v757_v56  ;;  %v1497_v57 = vpop.f32.mrf.mxu1 }
 0x2a4   :  { %v587_v58 = vpop.f32.mrf.mxu1 }
 0x2a5   :  { %v729_v36 = vmul.f32 0.17677669, %v587_v58 }
 0x2a6   :  { %v1502_v59 = vpop.f32.mrf.mxu1 }
 0x2a7   :  { %v743_v60 = vadd.f32 %v738_v19, %v729_v36 }
 0x2a8   :  { %v590_v61 = vpop.f32.mrf.mxu1 }
 0x2a9   :  { %v760_v62 = vsel %vm747_vm4, %v743_v60, -inf }
 0x2aa   :  { %761 = vmax.xlane.f32.xlu1 %v760_v62  ;;  %v1503_v63 = vpop.f32.mrf.mxu1 }
 0x2ac   :  { %v633_v0 = vpop.f32.mrf.mxu1 }
 0x2ad   :  { %v730_v1 = vmul.f32 0.17677669, %v633_v0 }
 0x2ae   :  { %v1508_v2 = vpop.f32.mrf.mxu1 }
 0x2af   :  { %v744_v3 = vadd.f32 %v738_v19, %v730_v1 }
 0x2b0   :  { %v636_v4 = vpop.f32.mrf.mxu1 }
 0x2b1   :  { %v763_v5 = vsel %vm747_vm4, %v744_v3, -inf  ;;  %v366_v4 = vpack.c.bf16 %v1833_v33, %v1833_v33 }
 0x2b2   :  { %764 = vmax.xlane.f32.xlu0 %v763_v5  ;;  %v1509_v6 = vpop.f32.mrf.mxu1  ;;  %v367_v5 = vpack.c.bf16 %v1844_v37, %v1844_v37 }
 0x2b3   :  { %v365_v6 = vpack.c.bf16 %v1794_v25, %v1794_v25 }
 0x2b4   :  { %v676_v7 = vpop.f32.mrf.mxu1 }
 0x2b5   :  { %v731_v8 = vmul.f32 0.17677669, %v676_v7 }
 0x2b6   :  { %v1514_v39 = vpop.f32.mrf.mxu1 }
 0x2b7   :  { %v745_v9 = vadd.f32 %v738_v19, %v731_v8 }
 0x2b8   :  { %v679_v10 = vpop.f32.mrf.mxu1 }
 0x2b9   :  { %v766_v11 = vsel %vm747_vm4, %v745_v9, -inf }
 0x2ba   :  { %767 = vmax.xlane.f32.xlu1 %v766_v11  ;;  %v1515_v12 = vpop.f32.mrf.mxu1 }
 0x2bc   :  { %v719_v13 = vpop.f32.mrf.mxu1 }
 0x2bd   :  { %v732_v14 = vmul.f32 0.17677669, %v719_v13 }
 0x2be   :  { %v1520_v15 = vpop.f32.mrf.mxu1 }
 0x2bf   :  { %v746_v40 = vadd.f32 %v738_v19, %v732_v14 }
 0x2c0   :  { %v722_v16 = vpop.f32.mrf.mxu1 }
 0x2c1   :  { %v769_v17 = vsel %vm747_vm4, %v746_v40, -inf }
 0x2c2   :  { %770 = vmax.xlane.f32.xlu0 %v769_v17  ;;  %v1521_v43 = vpop.f32.mrf.mxu1 }
 0x2c6   :  { %v750_v20 = vpop.xlane.xlu0 %749 }
 0x2c7   :  { %v772_v24 = vsub.f32 %v1970_v23, %v750_v20 }
 0x2c9   :  { %v780_v27 = vmul.f32 1.442695, %v772_v24 }
 0x2cb   :  { %845 = vrot.lane.b32.xlu1 %v364_v18, %s1691_s0 }
 0x2d0   :  { %v753_v45 = vpop.xlane.xlu1 %752 }
 0x2d1   :  { %v773_v49 = vsub.f32 %v740_v35, %v753_v45 }
 0x2d3   :  { %v782_v22 = vmul.f32 1.442695, %v773_v49 }
 0x2d5   :  { %1635 = vpow2.f32 %v782_v22 }
 0x2d6   :  { %1637 = vpow2.f32 %v780_v27 }
 0x2e2   :  { %v1988_v19 = vpop.eup %1635 }
 0x2e3   :  { %v799_v28 = vsel %vm747_vm4, %v1988_v19, 0.0  ;;  %v1638_v29 = vpop.eup %1637 }
 0x2e4   :  { %800 = vadd.xlane.f32.xlu0 %v799_v28  ;;  %v796_v21 = vsel %vm747_vm4, %v1638_v29, 0.0 }
 0x2ef   :  { %797 = vadd.xlane.f32.xlu1 %v796_v21 }
 0x323   :  { %v756_v30 = vpop.xlane.xlu0 %755 }
 0x324   :  { %v774_v32 = vsub.f32 %v1975_v47, %v756_v30 }
 0x326   :  { %v784_v35 = vmul.f32 1.442695, %v774_v32 }
 0x328   :  { %1639 = vpow2.f32 %v784_v35 }
 0x32b   :  { %v759_v31 = vpop.xlane.xlu0 %758 }
 0x32c   :  { %v775_v38 = vsub.f32 %v742_v34, %v759_v31 }
 0x32e   :  { %v786_v23 = vmul.f32 1.442695, %v775_v38 }
 0x330   :  { %1641 = vpow2.f32 %v786_v23 }
 0x333   :  { %v762_v41 = vpop.xlane.xlu1 %761 }
 0x334   :  { %v776_v42 = vsub.f32 %v743_v60, %v762_v41 }
 0x335   :  { %v1640_v44 = vpop.eup %1639 }
 0x336   :  { %v788_v46 = vmul.f32 1.442695, %v776_v42  ;;  %v802_v48 = vsel %vm747_vm4, %v1640_v44, 0.0 }
 0x337   :  { %803 = vadd.xlane.f32.xlu1 %v802_v48 }
 0x338   :  { %1643 = vpow2.f32 %v788_v46 }
 0x33b   :  { %v765_v50 = vpop.xlane.xlu0 %764 }
 0x33c   :  { %v777_v51 = vsub.f32 %v744_v3, %v765_v50 }
 0x33d   :  { %v1995_v52 = vpop.eup %1641 }
 0x33e   :  { %v790_v53 = vmul.f32 1.442695, %v777_v51  ;;  %v805_v47 = vsel %vm747_vm4, %v1995_v52, 0.0 }
 0x33f   :  { %806 = vadd.xlane.f32.xlu0 %v805_v47  ;;  %v1628_v47 = vld [vmem:[%s2098_s2 + $0x30] sm:$0xff]  }
 0x340   :  { %1645 = vpow2.f32 %v790_v53 }
 0x343   :  { %v768_v54 = vpop.xlane.xlu1 %767 }
 0x344   :  { %v778_v34 = vsub.f32 %v745_v9, %v768_v54  ;;  %v1629_v54 = vld [vmem:[%s2098_s2 + $0x28] sm:$0xff]  }
 0x345   :  { %v1644_v55 = vpop.eup %1643 }
 0x346   :  { %v792_v56 = vmul.f32 1.442695, %v778_v34  ;;  %v808_v57 = vsel %vm747_vm4, %v1644_v55, 0.0  ;;  %v1630_v34 = vld [vmem:[%s2098_s2 + $0x20] sm:$0xff]  }
 0x347   :  { %809 = vadd.xlane.f32.xlu1 %v808_v57  ;;  %v846_v58 = vpop.permute.xlu1 %845 }
 0x348   :  { %1647 = vpow2.f32 %v792_v56  ;;  %v852_v36 = vsel %vm850_vm5, %v846_v58, 0 }
 0x349   :  { %1523 = vmatpush3.bf16.msra.mxu0 %v852_v36 }
 0x34a   :  { %1534 = vmatprep.subr.bf16.mxu0 %v1692_v26 }
 0x34b   :  { %v771_v59 = vpop.xlane.xlu0 %770 }
 0x34c   :  { %v779_v60 = vsub.f32 %v746_v40, %v771_v59 }
 0x34d   :  { %v2002_v61 = vpop.eup %1645 }
 0x34e   :  { %v794_v62 = vmul.f32 1.442695, %v779_v60  ;;  %v811_v63 = vsel %vm747_vm4, %v2002_v61, 0.0 }
 0x34f   :  { %812 = vadd.xlane.f32.xlu0 %v811_v63 }
 0x350   :  { %1649 = vpow2.f32 %v794_v62  ;;  %v1631_v62 = vld [vmem:[%s2098_s2 + $0x18] sm:$0xff]  }
 0x355   :  { %v1648_v0 = vpop.eup %1647 }
 0x356   :  { %v814_v1 = vsel %vm747_vm4, %v1648_v0, 0.0 }
 0x357   :  { %815 = vadd.xlane.f32.xlu1 %v814_v1 }
 0x35d   :  { %v2007_v2 = vpop.eup %1649 }
 0x35e   :  { %v817_v3 = vsel %vm747_vm4, %v2007_v2, 0.0 }
 0x35f   :  { %818 = vadd.xlane.f32.xlu0 %v817_v3 }
 0x368   :  { %1030 = vrot.lane.b32.xlu1 %v366_v4, %s1691_s0 }
 0x36c   :  { %1079 = vrot.lane.b32.xlu1 %v367_v5, %s1691_s0 }
 0x36d   :  { %v801_v12 = vpop.xlane.xlu0 %800 }
 0x375   :  { %895 = vrot.lane.b32.xlu0 %v365_v6, %s1691_s0 }
 0x378   :  { %v798_v7 = vpop.xlane.xlu1 %797 }
 0x379   :  { %1651 = vrcp.f32 %v798_v7  ;;  %v1633_v7 = vld [vmem:[%s2098_s2 + $0x8] sm:$0xff]  }
 0x386   :  { %v1652_v8 = vpop.eup %1651 }
 0x387   :  { %v828_v39 = vmul.f32 %v1652_v8, %v1638_v29 }
 0x389   :  { %v836_v9 = vpack.c.bf16 %v828_v39, %v828_v39 }
 0x38b   :  { %1525 = vmatmul.mubr.msk.bf16.vlgmr.msra.gmra.mxu0 %vm747_vm4, %v836_v9  ;;  %v1634_v9 = vld [vmem:[%s2098_s2] sm:$0xff]  }
 0x38c   :  { %1535 = vmatpush3.bf16.msra.mxu0 %v852_v36  ;;  %1536 = vmatprep.mubr.msk.bf16.mxu0 %vm1696_vm0, %v1692_v26 }
 0x38d   :  { %1546 = vmatprep.subr.bf16.mxu0 %v1692_v26 }
 0x3c0   :  { %v804_v33 = vpop.xlane.xlu1 %803 }
 0x3c1   :  { %1653 = vrcp.f32 %v804_v33 }
 0x3c8   :  { %v807_v14 = vpop.xlane.xlu0 %806 }
 0x3ce   :  { %v1654_v37 = vpop.eup %1653 }
 0x3cf   :  { %v830_v10 = vmul.f32 %v1654_v37, %v1640_v44 }
 0x3d0   :  { %v810_v25 = vpop.xlane.xlu1 %809 }
 0x3d1   :  { %v838_v11 = vpack.c.bf16 %v830_v10, %v830_v10  ;;  %1655 = vrcp.f32 %v810_v25 }
 0x3d2   :  { %1657 = vrcp.f32 %v801_v12 }
 0x3d3   :  { %1537 = vmatmul.mubr.msk.bf16.vlgmr.msra.gmra.mxu0 %vm747_vm4, %v838_v11 }
 0x3d4   :  { %1548 = vmatprep.mubr.msk.bf16.mxu0 %vm1696_vm0, %v1692_v26 }
 0x3d8   :  { %v813_v16 = vpop.xlane.xlu0 %812 }
 0x3de   :  { %v1656_v13 = vpop.eup %1655 }
 0x3df   :  { %v832_v40 = vmul.f32 %v1656_v13, %v1644_v55  ;;  %v1658_v45 = vpop.eup %1657 }
 0x3e0   :  { %v816_v15 = vpop.xlane.xlu1 %815  ;;  %v829_v20 = vmul.f32 %v1658_v45, %v1988_v19 }
 0x3e1   :  { %1659 = vrcp.f32 %v816_v15  ;;  %v840_v18 = vpack.c.bf16 %v832_v40, %v832_v40 }
 0x3e2   :  { %1661 = vrcp.f32 %v807_v14  ;;  %v837_v28 = vpack.c.bf16 %v829_v20, %v829_v20 }
 0x3e3   :  { %1663 = vrcp.f32 %v813_v16 }
 0x3e4   :  { %v1031_v17 = vpop.permute.xlu1 %1030 }
 0x3e5   :  { %v1036_v43 = vsel %vm850_vm5, %v1031_v17, 0 }
 0x3e6   :  { %1547 = vmatpush3.bf16.msra.mxu0 %v1036_v43 }
 0x3e7   :  { %1558 = vmatprep.subr.bf16.mxu0 %v1692_v26 }
 0x3e8   :  { %v819_v49 = vpop.xlane.xlu0 %818  ;;  %v1080_v32 = vpop.permute.xlu1 %1079 }
 0x3e9   :  { %1549 = vmatmul.mubr.msk.bf16.vlgmr.msra.gmra.mxu0 %vm747_vm4, %v840_v18  ;;  %1665 = vrcp.f32 %v819_v49  ;;  %v1085_v38 = vsel %vm850_vm5, %v1080_v32, 0 }
 0x3ea   :  { %1559 = vmatpush3.bf16.msra.mxu0 %v1036_v43  ;;  %1560 = vmatprep.mubr.msk.bf16.mxu0 %vm1696_vm0, %v1692_v26 }
 0x3eb   :  { %1570 = vmatprep.subr.bf16.mxu0 %v1692_v26 }
 0x3ec   :  { %v896_v22 = vpop.permute.xlu0 %895 }
 0x3ed   :  { %v901_v24 = vsel %vm850_vm5, %v896_v22, 0 }
 0x3ee   :  { %v1660_v27 = vpop.eup %1659  ;;  %1529 = vmatpush3.bf16.msra.mxu1 %v901_v24 }
 0x3ef   :  { %1540 = vmatprep.subr.bf16.mxu1 %v1692_v26  ;;  %v834_v29 = vmul.f32 %v1660_v27, %v1648_v0  ;;  %v1662_v21 = vpop.eup %1661  ;;  %v1632_v0 = vld [vmem:[%s2098_s2 + $0x10] sm:$0xff]  }
 0x3f0   :  { %v831_v19 = vmul.f32 %v1662_v21, %v1995_v52  ;;  %v1664_v31 = vpop.eup %1663  ;;  %v1627_v52 = vld [vmem:[%s2098_s2 + $0x38] sm:$0xff]   ;;  %s1698_s2 = smov [#allocation2]  }
 0x3f1   :  { %1531 = vmatmul.mubr.msk.bf16.vlgmr.msra.gmra.mxu1 %vm747_vm4, %v837_v28  ;;  %v842_v30 = vpack.c.bf16 %v834_v29, %v834_v29  ;;  %v833_v23 = vmul.f32 %v1664_v31, %v2002_v61  ;;  %s1369_s23 = sshll.u32 %s1698_s2, 4  ;;  %s1370_s23 = int_to_ptr.vmem [resolvable:$true] %s1369_s23 }
 0x3f2   :  { %1541 = vmatpush3.bf16.msra.mxu1 %v901_v24  ;;  %1542 = vmatprep.mubr.msk.bf16.mxu1 %vm1696_vm0, %v1692_v26  ;;  %v839_v35 = vpack.c.bf16 %v831_v19, %v831_v19  ;;  %s1667_s24 = scalar_lea.vmem %s1370_s23, 256  ;;  %p1672_p1 = scmp.lt.s32.totalorder %s1370_s23, %s1370_s23 }
 0x3f3   :  { %1561 = vmatmul.mubr.msk.bf16.vlgmr.msra.gmra.mxu0 %vm747_vm4, %v842_v30  ;;  %1552 = vmatprep.subr.bf16.mxu1 %v1692_v26  ;;  %v841_v41 = vpack.c.bf16 %v833_v23, %v833_v23  ;;  %p1668_p0 = scmp.ne.s32.totalorder %s1370_s23, %s1667_s24  ;;  %p1673_p2 = scmp.lt.s32.totalorder %s1667_s24, %s1667_s24 }
 0x3f4   :  { %1586 = vmatprep.mubr.msk.bf16.mxu0 %vm1696_vm0, %v1692_v26  ;;  %1571 = vmatpush3.bf16.msra.mxu0 %v1627_v52 }
 0x3f5   :  { %1572 = vmatprep.subr.bf16.mxu0 %v1692_v26  ;;  %p1674_p3 = por %p1673_p2, %p1672_p1 }
 0x3f6   :  { %v1666_v42 = vpop.eup %1665 }
 0x3f7   :  { %v835_v44 = vmul.f32 %v1666_v42, %v2007_v2  ;;  %p1675_p4 = pnand %p1674_p3, %p1668_p0 }
 0x3f8   :  { %1573 = vmatpush3.bf16.msra.mxu0 %v1628_v47 }
 0x3f9   :  { %1543 = vmatmul.mubr.msk.bf16.vlgmr.msra.gmra.mxu1 %vm747_vm4, %v839_v35  ;;  %v843_v46 = vpack.c.bf16 %v835_v44, %v835_v44  ;;  %1574 = vmatprep.subr.bf16.mxu0 %v1692_v26 }
 0x3fa   :  { %1553 = vmatpush3.bf16.msra.mxu1 %v1085_v38  ;;  %1554 = vmatprep.mubr.msk.bf16.mxu1 %vm1696_vm0, %v1692_v26 }
 0x3fb   :  { %1564 = vmatprep.subr.bf16.mxu1 %v1692_v26 }
 0x3fc   :  { %1575 = vmatpush3.bf16.msra.mxu0 %v1629_v54 }
 0x3fd   :  { %1576 = vmatprep.subr.bf16.mxu0 %v1692_v26 }
 0x400   :  { %1577 = vmatpush3.bf16.msra.mxu0 %v1630_v34 }
 0x401   :  { %1555 = vmatmul.mubr.msk.bf16.vlgmr.msra.gmra.mxu1 %vm747_vm4, %v841_v41  ;;  %1578 = vmatprep.subr.bf16.mxu0 %v1692_v26 }
 0x402   :  { %1565 = vmatpush3.bf16.msra.mxu1 %v1085_v38  ;;  %1566 = vmatprep.mubr.msk.bf16.mxu1 %vm1696_vm0, %v1692_v26 }
 0x404   :  { %1579 = vmatpush3.bf16.msra.mxu0 %v1631_v62 }
 0x405   :  { %1580 = vmatprep.subr.bf16.mxu0 %v1692_v26 }
 0x408   :  { %1581 = vmatpush3.bf16.msra.mxu0 %v1632_v0 }
 0x409   :  { %1567 = vmatmul.mubr.msk.bf16.vlgmr.msra.gmra.mxu1 %vm747_vm4, %v843_v46  ;;  %1582 = vmatprep.subr.bf16.mxu0 %v1692_v26 }
 0x40c   :  { %1583 = vmatpush3.bf16.msra.mxu0 %v1633_v7 }
 0x40d   :  { %1584 = vmatprep.subr.bf16.mxu0 %v1692_v26 }
 0x410   :  { %1585 = vmatpush3.bf16.msra.mxu0 %v1634_v9 }
 0x44b   :  { %v2055_v48 = vpop.f32.mrf.mxu0 }
 0x44d   :  { %v1526_v50 = vpop.f32.mrf.mxu0 }
 0x44f   :  { %v891_v51 = vpop.f32.mrf.mxu0 }
 0x451   :  { %v1527_v53 = vpop.f32.mrf.mxu0 }
 0x493   :  { %v980_v55 = vpop.f32.mrf.mxu0 }
 0x495   :  { %v1538_v56 = vpop.f32.mrf.mxu0 }
 0x497   :  { %v983_v57 = vpop.f32.mrf.mxu0 }
 0x499   :  { %v1539_v58 = vpop.f32.mrf.mxu0 }
 0x4a9   :  { %v1072_v36 = vpop.f32.mrf.mxu0 }
 0x4ab   :  { %v1550_v59 = vpop.f32.mrf.mxu0 }
 0x4ad   :  { %v1075_v60 = vpop.f32.mrf.mxu0 }
 0x4af   :  { %v1551_v61 = vpop.f32.mrf.mxu0 }
 0x4b1   :  { %v937_v63 = vpop.f32.mrf.mxu1 }
 0x4b2   :  { %v1429_v45 = vpack.c.bf16 %v937_v63, %v2055_v48 }
 0x4b3   :  { %v1532_v1 = vpop.f32.mrf.mxu1  ;;  %v1164_v2 = vpop.f32.mrf.mxu0 }
 0x4b5   :  { %v940_v3 = vpop.f32.mrf.mxu1  ;;  %v1562_v4 = vpop.f32.mrf.mxu0 }
 0x4b7   :  { %v1533_v5 = vpop.f32.mrf.mxu1  ;;  %v1167_v6 = vpop.f32.mrf.mxu0 }
 0x4b9   :  { %v1023_v8 = vpop.f32.mrf.mxu1  ;;  %v1563_v39 = vpop.f32.mrf.mxu0 }
 0x4ba   :  { %v1430_v33 = vpack.c.bf16 %v1023_v8, %v980_v55 }
 0x4bb   :  { %v1544_v37 = vpop.f32.mrf.mxu1 }
 0x4bc   :  { %1231 = vrot.lane.b32.xlu0 %v1430_v33, %s1693_s1 }
 0x4bd   :  { %v1026_v10 = vpop.f32.mrf.mxu1 }
 0x4bf   :  { %v1545_v25 = vpop.f32.mrf.mxu1 }
 0x4c1   :  { %v1121_v11 = vpop.f32.mrf.mxu1 }
 0x4c2   :  { %v1431_v12 = vpack.c.bf16 %v1121_v11, %v1072_v36 }
 0x4c3   :  { %v1556_v13 = vpop.f32.mrf.mxu1 }
 0x4c4   :  { %1238 = vrot.lane.b32.xlu1 %v1431_v12, %s1691_s0 }
 0x4c5   :  { %v1124_v14 = vpop.f32.mrf.mxu1 }
 0x4c7   :  { %v1557_v15 = vpop.f32.mrf.mxu1 }
 0x4c9   :  { %v1207_v40 = vpop.f32.mrf.mxu1 }
 0x4ca   :  { %v1432_v16 = vpack.c.bf16 %v1207_v40, %v1164_v2 }
 0x4cb   :  { %v1568_v17 = vpop.f32.mrf.mxu1 }
 0x4cc   :  { %1245 = vrot.lane.b32.xlu0 %v1432_v16, %s1690_s27 }
 0x4cd   :  { %v1210_v43 = vpop.f32.mrf.mxu1 }
 0x4cf   :  { %v1569_v26 = vpop.f32.mrf.mxu1 }
 0x52e   :  { %v1232_v18 = vpop.permute.xlu0 %1231 }
 0x52f   :  { %v1249_v20 = vsel %vm368_vm2, %v1429_v45, %v1232_v18 }
 0x536   :  { %v1239_v49 = vpop.permute.xlu1 %1238 }
 0x537   :  { %v1252_v22 = vsel %vm1250_vm6, %v1249_v20, %v1239_v49 }
 0x53e   :  { %v1246_v24 = vpop.permute.xlu0 %1245 }
 0x53f   :  { %v1255_v27 = vsel %vm1253_vm7, %v1252_v22, %v1246_v24 }
 0x540   :  { %1587 = vmatmul.mubr.bf16.vlgmr.msra.gmra.mxu0 %v1255_v27 }
 0x600   :  { %v1355_v28 = vpop.f32.mrf.mxu0 }
 0x601   :  { %1362 = vst [vmem:[#allocation2] sm:$0xff] %v1355_v28 }
 0x602   :  { %v1588_v29 = vpop.f32.mrf.mxu0 }
 0x604   :  { %v1358_v21 = vpop.f32.mrf.mxu0 }
 0x605   :  { %1363 = vst [vmem:[#allocation2 + $0x8] sm:$0xff] %v1358_v21 }
 0x606   :  { %v1589_v30 = vpop.f32.mrf.mxu0 }
 0x607   :  { %1678 = shalt.err (!%p1675_p4)
}
 0x608   :  { %s1699_s25 = smov 128   ;;  %s1700_s26 = smov 8  }
 0x609   :  { %1375 = dma.vmem_to_hbm [thread:$0]  %s1370_s23, 256, %s2101_s5, [#allocation3], %s1699_s25, %s1699_s25, %s1700_s26  }
 0x60a   :  { %1687 = dma.done.wait [#allocation3], 256  }
 0x60b   :  { %1688 = vsyncadd [#allocation3], 4294967040 }
 0x60c   :  { %1379 = vsyncpa [#allocation3], 1 }

</bundles_post_ra>
